<compile_context>
chip_gen: v5e
topology: v5e:2x2
jax: 0.10.0
libtpu: 0.0.40
codegen_flags: <defaults>
</compile_context>

<pallas_src>
import functools
import math

import jax
import jax.numpy as jnp
import numpy as np
from jax.experimental import pallas as pl
from jax.experimental.pallas import tpu as pltpu

BANDWIDTH = 0.05  # deterministic "parameter" from Kernel.__init__ default


def _round_up(x, m):
    return ((x + m - 1) // m) * m


def _kde_kernel(train_ref, test_ref, out_ref, *, scale):
    # train_ref : (tile_m, Daug)  rows = [2*s*x, -||s*x||^2, 1]  (padded rows: -1e30 bias)
    # test_ref  : (Daug, tile_n)  cols = [s*t;  1;  -||s*t||^2]
    # out_ref   : (1, 1, tile_n)  accumulator, resident across the reduction axis
    j = pl.program_id(1)

    # Full exponent -||t - x||^2 / (2*var) straight off the MXU (f32 accumulate).
    e = jnp.dot(train_ref[...], test_ref[...],
                preferred_element_type=jnp.float32)            # (tile_m, tile_n)
    p = jnp.exp(jnp.minimum(e, 0.0))                           # EUP; padded rows -> 0
    partial = jnp.sum(p, axis=0, keepdims=True)                # (1, tile_n) sublane reduce

    @pl.when(j == 0)
    def _():
        out_ref[...] = jnp.zeros_like(out_ref)

    out_ref[...] += partial.reshape(out_ref.shape)

    @pl.when(j == pl.num_programs(1) - 1)
    def _():
        # Fold coef / M into one multiply per test point.
        out_ref[...] = out_ref[...] * jnp.float32(scale)


def gaussian_kde_forward(test_data, train_data, bandwidth=BANDWIDTH, *,
                         tile_n=512, tile_m=None):
    """Pallas TPU implementation of GaussianKernel(Kernel).forward."""
    test_data = jnp.asarray(test_data, jnp.float32)
    train_data = jnp.asarray(train_data, jnp.float32)
    N, D = test_data.shape
    M, Dt = train_data.shape
    assert D == Dt
    Daug = D + 2

    # Distances are translation invariant: mean-center to reduce cancellation
    # in the ||t||^2 + ||x||^2 - 2 t.x identity.
    center = jnp.mean(train_data, axis=0, keepdims=True)
    tr = train_data - center
    te = test_data - center

    var = float(bandwidth) ** 2
    s = 1.0 / (math.sqrt(2.0) * float(bandwidth))      # ||s*(t-x)||^2 = ||t-x||^2 / (2*var)
    coef = 1.0 / math.sqrt(2.0 * math.pi * var)
    scale = coef / float(M)

    xs = tr * jnp.float32(s)
    ts = te * jnp.float32(s)
    x_norm = jnp.sum(xs * xs, axis=1, keepdims=True)    # (M, 1)
    t_norm = jnp.sum(ts * ts, axis=1, keepdims=True)    # (N, 1)

    # Augmented operands: dot(train_aug, test_aug^T) = 2 x'.t' - ||x'||^2 - ||t'||^2.
    train_aug = jnp.concatenate(
        [2.0 * xs, -x_norm, jnp.ones((M, 1), jnp.float32)], axis=1)   # (M, Daug)
    test_aug = jnp.concatenate(
        [ts, jnp.ones((N, 1), jnp.float32), -t_norm], axis=1)         # (N, Daug)

    # ---- tile selection ----
    n_pad128 = _round_up(max(N, 1), 128)
    tile_n = _round_up(min(tile_n, n_pad128), 128)
    if n_pad128 // tile_n < 2 and n_pad128 >= 256:
        # ensure the "parallel" test axis has >= 2 blocks (v7x has 2 TensorCores)
        tile_n = _round_up((n_pad128 + 1) // 2, 128)

    m8 = _round_up(max(M, 1), 8)
    if tile_m is None:
        # Collapse the reduction axis when the whole (padded) train set fits
        # comfortably in VMEM: single step, train DMA'd once, no accumulation.
        if m8 <= 2048 and m8 * Daug * 4 <= (4 << 20):
            tile_m = m8
        else:
            tile_m = 1024
    tile_m = _round_up(min(tile_m, m8), 8)

    n_pad = _round_up(N, tile_n)
    m_pad = _round_up(M, tile_m)

    # Pad. Padded train rows get a huge negative bias in the "-||x'||^2" slot so
    # exp() underflows to exactly 0 -> no in-kernel mask.  Padded test columns
    # are all-zero and sliced off at the end.
    if m_pad != M:
        pad_rows = jnp.zeros((m_pad - M, Daug), jnp.float32).at[:, D].set(jnp.float32(-1e30))
        train_aug = jnp.concatenate([train_aug, pad_rows], axis=0)
    if n_pad != N:
        test_aug = jnp.pad(test_aug, ((0, n_pad - N), (0, 0)))
    test_aug_t = test_aug.T                                            # (Daug, n_pad)

    num_n = n_pad // tile_n
    num_m = m_pad // tile_m

    kernel = functools.partial(_kde_kernel, scale=scale)

    out = pl.pallas_call(
        kernel,
        out_shape=jax.ShapeDtypeStruct((num_n, 1, tile_n), jnp.float32),
        grid_spec=pltpu.PrefetchScalarGridSpec(
            num_scalar_prefetch=0,
            grid=(num_n, num_m),                                       # reduction axis last
            in_specs=[
                pl.BlockSpec((tile_m, Daug), lambda i, j: (j, 0)),     # train tile
                pl.BlockSpec((Daug, tile_n), lambda i, j: (0, i)),     # test^T tile
            ],
            out_specs=pl.BlockSpec((1, 1, tile_n), lambda i, j: (i, 0, 0)),
        ),
        compiler_params=pltpu.CompilerParams(
            dimension_semantics=("parallel", "arbitrary"),
            vmem_limit_bytes=32 * 1024 * 1024,
        ),
        cost_estimate=pl.CostEstimate(
            flops=2 * N * M * Daug + 2 * N * M,
            transcendentals=N * M,
            bytes_accessed=(N * Daug + M * Daug + N) * 4,
        ),
    )(train_aug, test_aug_t)

    return out.reshape(n_pad)[:N]


def _reference(test_data, train_data, bandwidth=BANDWIDTH):
    diffs = test_data[:, None, :] - train_data[None, :, :]
    x_sq = jnp.sum(diffs * diffs, axis=-1)
    var = bandwidth * bandwidth
    coef = 1.0 / np.sqrt(2.0 * np.pi * var)
    return jnp.mean(coef * jnp.exp(-x_sq / (2.0 * var)), axis=1)


# TODO(synk): Kernel.sample (abstract) is a random-sampling method with no single
# canonical Pallas hot path; only the forward (density) pass is implemented here.

if __name__ == "__main__":
    key = jax.random.PRNGKey(0)
    k1, k2, k3 = jax.random.split(key, 3)

    D = 8
    # Case 1: small N/M, default tiles -> single reduction step (train fits VMEM),
    # exercises padded test lanes and the single-block parallel axis.
    N, M = 20, 37
    test_data = jax.random.normal(k1, (N, D), dtype=jnp.float32) * 0.02
    train_data = jax.random.normal(k2, (M, D), dtype=jnp.float32) * 0.02

    out = jax.block_until_ready(gaussian_kde_forward(test_data, train_data))
    ref = jax.block_until_ready(_reference(test_data, train_data))
    np.testing.assert_allclose(np.asarray(out), np.asarray(ref), rtol=1e-4, atol=1e-6)

    # Case 2: force a multi-step reduction (tile_m=16 -> 3 steps, sentinel-padded
    # train rows) and a multi-block parallel axis (N=300 -> 2 test tiles).
    N2 = 300
    test2 = jax.random.normal(k3, (N2, D), dtype=jnp.float32) * 0.02
    out2 = jax.block_until_ready(gaussian_kde_forward(test2, train_data, tile_m=16))
    ref2 = jax.block_until_ready(_reference(test2, train_data))
    np.testing.assert_allclose(np.asarray(out2), np.asarray(ref2), rtol=1e-4, atol=1e-6)

    print("KERNEL_OK")
</pallas_src>

<mosaic_0001>
module attributes {stable_mosaic.version = 11 : i64} {
  func.func @_kde_kernel(%arg0: i32, %arg1: i32, %arg2: memref<40x10xf32, #tpu.memory_space<vmem>>, %arg3: memref<10x128xf32, #tpu.memory_space<vmem>>, %arg4: memref<1x1x128xf32, #tpu.memory_space<vmem>>) attributes {dimension_semantics = [#tpu.dimension_semantics<parallel>, #tpu.dimension_semantics<arbitrary>], iteration_bounds = array<i64: 1, 1>, scalar_prefetch = 0 : i64, scratch_operands = 0 : i64, tpu.core_type = #tpu.core_type<tc>, window_params = [{transform_indices = @transform_0, window_bounds = array<i64: 40, 10>}, {transform_indices = @transform_1, window_bounds = array<i64: 10, 128>}, {transform_indices = @transform_2, window_bounds = array<i64: 1, 1, 128>}]} {
    %c0 = arith.constant 0 : index
    %c0_0 = arith.constant 0 : index
    %0 = vector.load %arg2[%c0, %c0_0] : memref<40x10xf32, #tpu.memory_space<vmem>>, vector<40x10xf32>
    %c0_1 = arith.constant 0 : index
    %c0_2 = arith.constant 0 : index
    %1 = vector.load %arg3[%c0_1, %c0_2] : memref<10x128xf32, #tpu.memory_space<vmem>>, vector<10x128xf32>
    %cst = arith.constant dense<0.000000e+00> : vector<40x128xf32>
    %2 = tpu.matmul %0, %1, %cst {dimension_numbers = #tpu.dot_dimension_numbers<[1], [0], [0], [1], [0, 0, 1, 1], [], []>} : vector<40x10xf32>, vector<10x128xf32>, vector<40x128xf32> -> vector<40x128xf32>
    %cst_3 = arith.constant 0.000000e+00 : f32
    %3 = vector.broadcast %cst_3 : f32 to vector<40x128xf32>
    %4 = arith.minimumf %2, %3 : vector<40x128xf32>
    %5 = math.exp %4 : vector<40x128xf32>
    %cst_4 = arith.constant dense<0.000000e+00> : vector<128xf32>
    %6 = vector.multi_reduction <add>, %5, %cst_4 [0] : vector<40x128xf32> to vector<128xf32>
    %7 = vector.shape_cast %6 : vector<128xf32> to vector<1x128xf32>
    %c0_i32 = arith.constant 0 : i32
    %8 = arith.cmpi eq, %arg1, %c0_i32 : i32
    %9 = arith.extui %8 : i1 to i32
    %c0_i32_5 = arith.constant 0 : i32
    %10 = arith.cmpi ne, %9, %c0_i32_5 : i32
    scf.if %10 {
      %cst_14 = arith.constant 0.000000e+00 : f32
      %18 = vector.broadcast %cst_14 : f32 to vector<1x1x128xf32>
      %c0_15 = arith.constant 0 : index
      %c0_16 = arith.constant 0 : index
      %c0_17 = arith.constant 0 : index
      %19 = vector.load %arg4[%c0_15, %c0_16, %c0_17] : memref<1x1x128xf32, #tpu.memory_space<vmem>>, vector<1x1x128xf32>
      tpu.vector_store %arg4[%c0_15, %c0_16, %c0_17], %18 {strides = array<i32>} : memref<1x1x128xf32, #tpu.memory_space<vmem>>, vector<1x1x128xf32>,
    } else {
    }
    %c0_6 = arith.constant 0 : index
    %c0_7 = arith.constant 0 : index
    %c0_8 = arith.constant 0 : index
    %11 = vector.load %arg4[%c0_6, %c0_7, %c0_8] : memref<1x1x128xf32, #tpu.memory_space<vmem>>, vector<1x1x128xf32>
    %12 = vector.shape_cast %7 : vector<1x128xf32> to vector<1x1x128xf32>
    %13 = arith.addf %11, %12 : vector<1x1x128xf32>
    %c0_9 = arith.constant 0 : index
    %c0_10 = arith.constant 0 : index
    %c0_11 = arith.constant 0 : index
    %14 = vector.load %arg4[%c0_9, %c0_10, %c0_11] : memref<1x1x128xf32, #tpu.memory_space<vmem>>, vector<1x1x128xf32>
    tpu.vector_store %arg4[%c0_9, %c0_10, %c0_11], %13 {strides = array<i32>} : memref<1x1x128xf32, #tpu.memory_space<vmem>>, vector<1x1x128xf32>,
    %c0_i32_12 = arith.constant 0 : i32
    %15 = arith.cmpi eq, %arg1, %c0_i32_12 : i32
    %16 = arith.extui %15 : i1 to i32
    %c0_i32_13 = arith.constant 0 : i32
    %17 = arith.cmpi ne, %16, %c0_i32_13 : i32
    scf.if %17 {
      %c0_14 = arith.constant 0 : index
      %c0_15 = arith.constant 0 : index
      %c0_16 = arith.constant 0 : index
      %18 = vector.load %arg4[%c0_14, %c0_15, %c0_16] : memref<1x1x128xf32, #tpu.memory_space<vmem>>, vector<1x1x128xf32>
      %cst_17 = arith.constant 0.215644479 : f32
      %19 = vector.broadcast %cst_17 : f32 to vector<1x1x128xf32>
      %20 = arith.mulf %18, %19 : vector<1x1x128xf32>
      %c0_18 = arith.constant 0 : index
      %c0_19 = arith.constant 0 : index
      %c0_20 = arith.constant 0 : index
      %21 = vector.load %arg4[%c0_18, %c0_19, %c0_20] : memref<1x1x128xf32, #tpu.memory_space<vmem>>, vector<1x1x128xf32>
      tpu.vector_store %arg4[%c0_18, %c0_19, %c0_20], %20 {strides = array<i32>} : memref<1x1x128xf32, #tpu.memory_space<vmem>>, vector<1x1x128xf32>,
    } else {
    }
    return
  }
  func.func @transform_0(%arg0: i32, %arg1: i32) -> (i32, i32) {
    %c0_i32 = arith.constant 0 : i32
    %c0_i32_0 = arith.constant 0 : i32
    return %arg1, %c0_i32 : i32, i32
  }
  func.func @transform_1(%arg0: i32, %arg1: i32) -> (i32, i32) {
    %c0_i32 = arith.constant 0 : i32
    %c0_i32_0 = arith.constant 0 : i32
    return %c0_i32, %arg0 : i32, i32
  }
  func.func @transform_2(%arg0: i32, %arg1: i32) -> (i32, i32, i32) {
    %c0_i32 = arith.constant 0 : i32
    %c0_i32_0 = arith.constant 0 : i32
    %c0_i32_1 = arith.constant 0 : i32
    return %arg0, %c0_i32, %c0_i32_0 : i32, i32, i32
  }
}

</mosaic_0001>

<bundles_post_ra>
// kernel: tpu_custom_call.1
= control target key start
LH: loop header
LB: loop body
LE: loop exit
PB: predicated region body
PF: predicated region fallthrough
CT: control target
= control target key end

     0   :  { %vm35_vm0 = vcmask 1041408   ;;  %vm19_vm1 = vcmask 80896   ;;  %s222_s0 = inlined_call_operand.vmem [shape: f32[40,10], index: 0, kind: input, shape index: {}]   ;;  %s223_s1 = inlined_call_operand.vmem [shape: f32[10,128], index: 1, kind: input, shape index: {}]   ;;  %s224_s2 = inlined_call_operand.hbm [shape: f32[1,1,128], index: 2, kind: output, shape index: {}]  }
   0x1   :  { %v18_v0 = vld [vmem:[%s223_s1 + $0x8] sm:$0x3]  ;;  %v17_v1 = vld [vmem:[%s223_s1] sm:$0xff]  ;;  %v14_v2 = vld [vmem:[%s222_s0 + $0x10] sm:$0xff] }
   0x2   :  { %133 = vmatpush.msk.msra.mxu2 %vm35_vm0, %v18_v0  ;;  %126 = vmatpush.msk.msra.mxu0 %vm35_vm0, %v18_v0  ;;  %v12_v3 = vld [vmem:[%s222_s0] sm:$0xff]  ;;  %v13_v4 = vld [vmem:[%s222_s0 + $0x8] sm:$0xff] }
   0x3   :  { %132 = vmatpush.msk.msra.mxu1 %vm35_vm0, %v18_v0  ;;  %134 = vmatpush.msk.msra.mxu3 %vm35_vm0, %v18_v0 }
   0x4   :  { %7 = vsyncpa [#allocation3], 0  ;;  %136 = vmatpush.msra.mxu2 %v17_v1  ;;  %54 = vmatpush.msra.mxu0 %v17_v1  ;;  %v16_v5 = vld [vmem:[%s222_s0 + $0x20] sm:$0xff]  ;;  %v15_v6 = vld [vmem:[%s222_s0 + $0x18] sm:$0xff]  ;;  %v176_v10 = vmov 0.0   ;;  %s177_s0 = smov [#allocation2]  }
   0x5   :  { %129 = vmatmul.msk.f32.vlgmr.msra.gmra.mxu2 %vm19_vm1, %v14_v2  ;;  %135 = vmatpush.msra.mxu1 %v17_v1  ;;  %100 = vst [vmem:[#allocation2] sm:$0x1] %v176_v10  ;;  %s115_s22 = sshll.u32 %s177_s0, 4  ;;  %s117_s25 = sshll.u32 %s224_s2, 4  ;;  %s116_s22 = int_to_ptr.vmem [resolvable:$true] %s115_s22  ;;  %s118_s25 = int_to_ptr.hbm [resolvable:$true] %s117_s25 }
   0x6   :  { %127 = vmatmul.msk.f32.vlgmr.msra.gmra.mxu0 %vm19_vm1, %v12_v3  ;;  %128 = vmatmul.msk.f32.vlgmr.msra.gmra.mxu1 %vm19_vm1, %v13_v4 }
   0x7   :  { %137 = vmatpush.msra.mxu3 %v17_v1 }
   0x8   :  { %131 = vmatmul.msk.f32.vlgmr.msra.gmra.mxu3 %vm19_vm1, %v16_v5 }
   0xc   :  { %v101_v37 = vld [vmem:[#allocation2] sm:$0x1] }
   0xd   :  { %130 = vmatmul.msk.f32.gmra.mxu2 %vm19_vm1, %v15_v6 }
  0x83   :  { %v56_v7 = vpop.f32.mrf.mxu0  ;;  %v59_v8 = vpop.f32.mrf.mxu1 }
  0x84   :  { %v71_v9 = vmin.f32 %v56_v7, 0.0  ;;  %v72_v11 = vmin.f32 %v59_v8, 0.0 }
  0x86   :  { %v76_v12 = vmul.f32 1.442695, %v71_v9  ;;  %v78_v14 = vmul.f32 1.442695, %v72_v11 }
  0x88   :  { %v62_v13 = vpop.f32.mrf.mxu2  ;;  %140 = vpow2.f32 %v76_v12 }
  0x89   :  { %v73_v15 = vmin.f32 %v62_v13, 0.0  ;;  %142 = vpow2.f32 %v78_v14 }
  0x8b   :  { %v68_v16 = vpop.f32.mrf.mxu3  ;;  %v80_v18 = vmul.f32 1.442695, %v73_v15 }
  0x8c   :  { %v75_v17 = vmin.f32 %v68_v16, 0.0 }
  0x8d   :  { %144 = vpow2.f32 %v80_v18 }
  0x8e   :  { %v84_v20 = vmul.f32 1.442695, %v75_v17  ;;  %v141_v22 = vpop.eup %140 }
  0x8f   :  { %v143_v23 = vpop.eup %142 }
  0x90   :  { %v65_v19 = vpop.f32.mrf.mxu2  ;;  %146 = vpow2.f32 %v84_v20  ;;  %v86_v25 = vadd.f32 %v143_v23, %v141_v22 }
  0x91   :  { %v74_v21 = vmin.f32 %v65_v19, 0.0 }
  0x93   :  { %v82_v24 = vmul.f32 1.442695, %v74_v21  ;;  %v145_v26 = vpop.eup %144 }
  0x94   :  { %v87_v28 = vadd.f32 %v145_v26, %v86_v25 }
  0x95   :  { %148 = vpow2.f32 %v82_v24 }
  0x96   :  { %v147_v27 = vpop.eup %146 }
  0x9b   :  { %v149_v29 = vpop.eup %148 }
  0x9c   :  { %v88_v30 = vadd.f32 %v149_v29, %v87_v28 }
  0x9e   :  { %v89_v31 = vadd.f32 %v147_v27, %v88_v30 }
  0xa0   :  { %v90_v32 = vrot.slane %v89_v31, 4 }
  0xa2   :  { %v91_v33 = vadd.f32 %v90_v32, %v89_v31 }
  0xa4   :  { %v92_v34 = vrot.slane %v91_v33, 2 }
  0xa6   :  { %v93_v35 = vadd.f32 %v92_v34, %v91_v33 }
  0xa8   :  { %v94_v36 = vrot.slane %v93_v35, 1 }
  0xaa   :  { %v95_v38 = vadd.f32 %v94_v36, %v93_v35 }
  0xac   :  { %v102_v39 = vadd.f32 %v101_v37, %v95_v38 }
  0xae   :  { %103 = vst [vmem:[#allocation2] sm:$0x1] %v102_v39 }
  0xb5   :  { %v107_v40 = vld [vmem:[#allocation2] sm:$0x1] }
  0xb6   :  { %v108_v41 = vmul.f32 0.21564448, %v107_v40 }
  0xb8   :  { %109 = vst [vmem:[#allocation2] sm:$0x1] %v108_v41 }
  0xb9   :  { %120 = dma.vmem_to_hbm [thread:$0]  %s116_s22, 16, %s118_s25, [#allocation3]  }
  0xba   :  { %174 = dma.done.wait [#allocation3], 16  }
  0xbb   :  { %175 = vsyncadd [#allocation3], 4294967280 }
  0xbc   :  { %125 = vsyncpa [#allocation3], 1 }

</bundles_post_ra>
